<compile_context>
chip_gen: v5e
topology: v5e:2x2
jax: 0.10.0
libtpu: 0.0.40
codegen_flags: <defaults>
</compile_context>

<pallas_src>
import numpy as np
import jax
import jax.numpy as jnp
from jax.experimental import pallas as pl
from jax.experimental.pallas import tpu as pltpu

WIN = 11      # window_size of the reference SSIM module
SIGMA = 1.5   # gaussian sigma of the reference SSIM module


def _gaussian_1d(window_size=WIN, sigma=SIGMA):
    """Same 1-D gaussian as pytorch-msssim's create_window (float32)."""
    coords = np.arange(window_size, dtype=np.float64)
    g = np.exp(-((coords - window_size // 2) ** 2) / (2.0 * sigma ** 2))
    g = g / g.sum()
    return g.astype(np.float32)


def _filter_matrices(h, w):
    """Shared banded matrices for the separable VALID gaussian filter.

    Gv (ho, h):  Gv @ X  == vertical   11-tap VALID conv (per image).
    Gw (w, wo):  Y  @ Gw == horizontal 11-tap VALID conv (per image).
    No block-diagonal / kron inflation: MXU work stays linear in packing.
    """
    g = _gaussian_1d()
    ho, wo = h - WIN + 1, w - WIN + 1
    gv = np.zeros((ho, h), np.float32)
    for r in range(ho):
        gv[r, r:r + WIN] = g
    gw = np.zeros((w, wo), np.float32)
    for c in range(wo):
        gw[c:c + WIN, c] = g
    return jnp.asarray(gv), jnp.asarray(gw)


def _vmem_estimate(bpg, h, w, in_bytes):
    """Rough per-step VMEM footprint (bytes) for `bpg` images per grid step."""
    ho, wo = h - WIN + 1, w - WIN + 1
    inp = 2 * 2 * bpg * h * w * in_bytes          # target+pred, double-buffered
    filt = (ho * h + w * wo) * 4                  # Gv + Gw (single-buffered)
    vres = bpg * ho * 5 * w * 4                   # vertical-pass intermediates
    flds = 8 * bpg * ho * wo * 4                  # 5 field maps + epilogue temps
    out = 2 * 8 * 128 * 4                         # per-step partial-sum block
    return inp + filt + vres + flds + out


def _choose_packing(nb, h, w, in_bytes, budget=20 << 20):
    """Pick (bh, bw): images packed per grid step along sublanes/lanes.

    Chosen from OUTPUT density (bw*(w-10) toward 128 lanes) under a VMEM
    budget, keeping >= 2 grid steps (pipelining + v7x dual-TensorCore split).
    """
    wo = w - WIN + 1
    divs = [d for d in range(1, nb + 1) if nb % d == 0]
    fitting = [d for d in divs if _vmem_estimate(d, h, w, in_bytes) <= budget] or [1]
    multi = [d for d in fitting if nb // d >= 2]
    bpg = max(multi) if multi else max(fitting)

    if w >= 128:
        bw = 1          # lanes already dense; host reshape stays free
    else:
        bw_divs = [d for d in range(1, bpg + 1) if bpg % d == 0]
        reach = [d for d in bw_divs if d * wo >= 128]
        bw = min(reach) if reach else max(bw_divs)
    return bpg // bw, bw


def _resident_spec(shape):
    """Grid-invariant VMEM operand: constant index_map, single-buffered."""
    try:
        return pl.BlockSpec(shape, lambda s: (0,) * len(shape),
                            pipeline_mode=pl.Buffered(1))
    except TypeError:   # older jax without pipeline_mode on BlockSpec
        return pl.BlockSpec(shape, lambda s: (0,) * len(shape))


def _make_ssim_kernel(bh, bw, h, w):
    """Kernel factory: one grid step processes bpg = bh*bw images."""
    bpg = bh * bw
    ho, wo = h - WIN + 1, w - WIN + 1

    def kernel(c_ref, gv_ref, gw_ref, t_ref, p_ref, out_ref):
        f32 = jnp.float32
        gv = gv_ref[...]                      # (ho, h), resident in VMEM
        gw = gw_ref[...]                      # (w, wo), resident in VMEM

        # Vertical gaussian pass: ONE MXU matmul per image over the five
        # lane-concatenated fields [x1 | x2 | x1^2 | x2^2 | x1*x2] -> (ho, 5w).
        vres = []
        for b in range(bpg):                  # static unrolled loop, bpg small
            x1 = t_ref[0, b].astype(f32)      # target image (h, w)
            x2 = p_ref[0, b].astype(f32)      # pred   image (h, w)
            fields = jnp.concatenate(
                [x1, x2, x1 * x1, x2 * x2, x1 * x2], axis=1)       # (h, 5w)
            vres.append(jnp.dot(gv, fields, preferred_element_type=f32))

        # Horizontal gaussian pass with the shared (w, wo) matrix, assembling
        # lane/sublane-packed (bh*ho, bw*wo) field maps (lane-dense epilogue).
        def hfield(f):
            cols = []
            for j in range(bw):
                parts = [vres[i * bw + j][:, f * w:(f + 1) * w]
                         for i in range(bh)]
                vj = parts[0] if bh == 1 else jnp.concatenate(parts, axis=0)
                cols.append(jnp.dot(vj, gw, preferred_element_type=f32))
            return cols[0] if bw == 1 else jnp.concatenate(cols, axis=1)

        mu1 = hfield(0)
        mu2 = hfield(1)
        e11 = hfield(2)
        e22 = hfield(3)
        e12 = hfield(4)

        mu1_sq = mu1 * mu1
        mu2_sq = mu2 * mu2
        mu1_mu2 = mu1 * mu2
        sigma1_sq = e11 - mu1_sq
        sigma2_sq = e22 - mu2_sq
        sigma12 = e12 - mu1_mu2

        c1 = c_ref[0]
        c2 = c_ref[1]
        num = (2.0 * mu1_mu2 + c1) * (2.0 * sigma12 + c2)
        den = (mu1_sq + mu2_sq + c1) * (sigma1_sq + sigma2_sq + c2)
        # Exact divide (den >= C1*C2 > 0): negligible cost, full accuracy.
        ssim_sum = jnp.sum(num / den)

        # Independent per-step partial sum in a lane-dense (1,8,128) block so
        # the grid axis is fully "parallel" (no shared scratch, no finalize).
        out_ref[...] = jnp.broadcast_to(ssim_sum, (1, 8, 128)).astype(f32)

    return kernel


def ssim_loss(pred, target, loss_weight=1.0, data_range=None):
    """loss_weight * (1 - SSIM(target, pred)); pred/target are NCHW."""
    n, ch, h, w = pred.shape
    assert target.shape == pred.shape
    assert h >= WIN and w >= WIN, "images must be at least 11x11"
    nb = n * ch
    ho, wo = h - WIN + 1, w - WIN + 1

    in_bytes = max(jnp.dtype(pred.dtype).itemsize,
                   jnp.dtype(target.dtype).itemsize)
    bh, bw = _choose_packing(nb, h, w, in_bytes)
    bpg = bh * bw
    nsteps = nb // bpg
    # TODO(synk): for very large images (whole-image field maps approaching the
    # VMEM budget, esp. v7x's 64 MiB) add an H-tiling grid axis with a WIN-1
    # row halo instead of whole-image blocks.

    # Free reshapes only -- no HBM transpose, no dtype blow-up before the DMA.
    targ_b = target.reshape(nsteps, bpg, h, w)
    pred_b = pred.reshape(nsteps, bpg, h, w)

    gv, gw = _filter_matrices(h, w)

    # Dynamic value-range logic of the reference ssim() (uses img1 = target).
    # Pass `data_range` explicitly in training loops to skip this extra pass.
    if data_range is None:
        max_val = jnp.where(jnp.max(target).astype(jnp.float32) > 128.0, 255.0, 1.0)
        min_val = jnp.where(jnp.min(target).astype(jnp.float32) < -0.5, -1.0, 0.0)
        L = max_val - min_val
    else:
        L = jnp.float32(data_range)
    c12 = jnp.stack([(0.01 * L) ** 2, (0.03 * L) ** 2]).astype(jnp.float32)

    est = _vmem_estimate(bpg, h, w, in_bytes)
    vmem_limit = int(min(max(int(est * 1.75), 16 << 20), 48 << 20))

    kernel = _make_ssim_kernel(bh, bw, h, w)
    partial = pl.pallas_call(
        kernel,
        out_shape=jax.ShapeDtypeStruct((nsteps, 8, 128), jnp.float32),
        grid=(nsteps,),
        in_specs=[
            pl.BlockSpec(memory_space=pltpu.MemorySpace.SMEM),       # [C1, C2]
            _resident_spec((ho, h)),                                 # Gv
            _resident_spec((w, wo)),                                 # Gw
            pl.BlockSpec((1, bpg, h, w), lambda s: (s, 0, 0, 0)),    # target tile
            pl.BlockSpec((1, bpg, h, w), lambda s: (s, 0, 0, 0)),    # pred tile
        ],
        out_specs=pl.BlockSpec((1, 8, 128), lambda s: (s, 0, 0)),
        compiler_params=pltpu.CompilerParams(
            dimension_semantics=("parallel",),
            vmem_limit_bytes=vmem_limit),
    )(c12, gv, gw, targ_b, pred_b)

    mean_ssim = jnp.sum(partial[:, 0, 0]) / float(nb * ho * wo)
    return loss_weight * (1.0 - mean_ssim)


def ssim_loss_ref(pred, target, loss_weight=1.0):
    """Pure-JAX reference mirroring the PyTorch code (for validation)."""
    n, c, h, w = pred.shape
    g = jnp.asarray(_gaussian_1d(), jnp.float32)
    w2d = jnp.outer(g, g)
    win = jnp.broadcast_to(w2d, (c, 1, WIN, WIN))

    def conv(x):
        return jax.lax.conv_general_dilated(
            x, win, window_strides=(1, 1), padding="VALID",
            dimension_numbers=("NCHW", "OIHW", "NCHW"),
            feature_group_count=c, precision=jax.lax.Precision.HIGHEST)

    img1, img2 = target.astype(jnp.float32), pred.astype(jnp.float32)
    max_val = jnp.where(jnp.max(img1) > 128, 255.0, 1.0)
    min_val = jnp.where(jnp.min(img1) < -0.5, -1.0, 0.0)
    L = max_val - min_val
    c1 = (0.01 * L) ** 2
    c2 = (0.03 * L) ** 2

    mu1 = conv(img1)
    mu2 = conv(img2)
    mu1_sq, mu2_sq, mu1_mu2 = mu1 * mu1, mu2 * mu2, mu1 * mu2
    sigma1_sq = conv(img1 * img1) - mu1_sq
    sigma2_sq = conv(img2 * img2) - mu2_sq
    sigma12 = conv(img1 * img2) - mu1_mu2

    v1 = 2.0 * sigma12 + c2
    v2 = sigma1_sq + sigma2_sq + c2
    ssim_map = ((2.0 * mu1_mu2 + c1) * v1) / ((mu1_sq + mu2_sq + c1) * v2)
    return loss_weight * (1.0 - jnp.mean(ssim_map))


if __name__ == "__main__":
    key = jax.random.PRNGKey(0)
    k1, k2 = jax.random.split(key)
    shape = (2, 4, 16, 16)  # (N, C, H, W)
    pred = jax.random.uniform(k1, shape, dtype=jnp.float32)
    target = jax.random.uniform(k2, shape, dtype=jnp.float32)

    loss = jax.jit(ssim_loss)(pred, target)
    jax.block_until_ready(loss)

    ref = ssim_loss_ref(pred, target, loss_weight=1.0)
    np.testing.assert_allclose(np.asarray(loss), np.asarray(ref),
                               rtol=1e-3, atol=5e-4)
    print("KERNEL_OK")
</pallas_src>

<mosaic_0001>
module attributes {stable_mosaic.version = 11 : i64} {
  func.func @kernel(%arg0: i32, %arg1: memref<2xf32, #tpu.memory_space<smem>>, %arg2: memref<6x16xf32, #tpu.memory_space<vmem>>, %arg3: memref<16x6xf32, #tpu.memory_space<vmem>>, %arg4: memref<1x4x16x16xf32, #tpu.memory_space<vmem>>, %arg5: memref<1x4x16x16xf32, #tpu.memory_space<vmem>>, %arg6: memref<1x8x128xf32, #tpu.memory_space<vmem>>) attributes {dimension_semantics = [#tpu.dimension_semantics<parallel>], iteration_bounds = array<i64: 2>, scalar_prefetch = 0 : i64, scratch_operands = 0 : i64, tpu.core_type = #tpu.core_type<tc>, window_params = [{transform_indices = @transform_0, window_bounds = array<i64: 2>}, {pipeline_mode = #tpu.pipeline_mode<synchronous>, transform_indices = @transform_1, window_bounds = array<i64: 6, 16>}, {pipeline_mode = #tpu.pipeline_mode<synchronous>, transform_indices = @transform_2, window_bounds = array<i64: 16, 6>}, {transform_indices = @transform_3, window_bounds = array<i64: 1, 4, 16, 16>}, {transform_indices = @transform_4, window_bounds = array<i64: 1, 4, 16, 16>}, {transform_indices = @transform_5, window_bounds = array<i64: 1, 8, 128>}]} {
    %c0 = arith.constant 0 : index
    %c0_0 = arith.constant 0 : index
    %0 = vector.load %arg2[%c0, %c0_0] : memref<6x16xf32, #tpu.memory_space<vmem>>, vector<6x16xf32>
    %c0_1 = arith.constant 0 : index
    %c0_2 = arith.constant 0 : index
    %1 = vector.load %arg3[%c0_1, %c0_2] : memref<16x6xf32, #tpu.memory_space<vmem>>, vector<16x6xf32>
    %c0_3 = arith.constant 0 : index
    %c0_4 = arith.constant 0 : index
    %c0_5 = arith.constant 0 : index
    %c0_6 = arith.constant 0 : index
    %2 = vector.load %arg4[%c0_3, %c0_4, %c0_5, %c0_6] : memref<1x4x16x16xf32, #tpu.memory_space<vmem>>, vector<1x1x16x16xf32>
    %3 = vector.shape_cast %2 : vector<1x1x16x16xf32> to vector<16x16xf32>
    %c0_7 = arith.constant 0 : index
    %c0_8 = arith.constant 0 : index
    %c0_9 = arith.constant 0 : index
    %c0_10 = arith.constant 0 : index
    %4 = vector.load %arg5[%c0_7, %c0_8, %c0_9, %c0_10] : memref<1x4x16x16xf32, #tpu.memory_space<vmem>>, vector<1x1x16x16xf32>
    %5 = vector.shape_cast %4 : vector<1x1x16x16xf32> to vector<16x16xf32>
    %6 = arith.mulf %3, %3 : vector<16x16xf32>
    %7 = arith.mulf %5, %5 : vector<16x16xf32>
    %8 = arith.mulf %3, %5 : vector<16x16xf32>
    %9 = tpu.concatenate %3, %5, %6, %7, %8 in 1 : vector<16x16xf32>, vector<16x16xf32>, vector<16x16xf32>, vector<16x16xf32>, vector<16x16xf32> -> vector<16x80xf32>
    %cst = arith.constant dense<0.000000e+00> : vector<6x80xf32>
    %10 = tpu.matmul %0, %9, %cst {dimension_numbers = #tpu.dot_dimension_numbers<[1], [0], [0], [1], [0, 0, 1, 1], [], []>} : vector<6x16xf32>, vector<16x80xf32>, vector<6x80xf32> -> vector<6x80xf32>
    %c0_11 = arith.constant 0 : index
    %c1 = arith.constant 1 : index
    %c0_12 = arith.constant 0 : index
    %c0_13 = arith.constant 0 : index
    %11 = vector.load %arg4[%c0_11, %c1, %c0_12, %c0_13] : memref<1x4x16x16xf32, #tpu.memory_space<vmem>>, vector<1x1x16x16xf32>
    %12 = vector.shape_cast %11 : vector<1x1x16x16xf32> to vector<16x16xf32>
    %c0_14 = arith.constant 0 : index
    %c1_15 = arith.constant 1 : index
    %c0_16 = arith.constant 0 : index
    %c0_17 = arith.constant 0 : index
    %13 = vector.load %arg5[%c0_14, %c1_15, %c0_16, %c0_17] : memref<1x4x16x16xf32, #tpu.memory_space<vmem>>, vector<1x1x16x16xf32>
    %14 = vector.shape_cast %13 : vector<1x1x16x16xf32> to vector<16x16xf32>
    %15 = arith.mulf %12, %12 : vector<16x16xf32>
    %16 = arith.mulf %14, %14 : vector<16x16xf32>
    %17 = arith.mulf %12, %14 : vector<16x16xf32>
    %18 = tpu.concatenate %12, %14, %15, %16, %17 in 1 : vector<16x16xf32>, vector<16x16xf32>, vector<16x16xf32>, vector<16x16xf32>, vector<16x16xf32> -> vector<16x80xf32>
    %cst_18 = arith.constant dense<0.000000e+00> : vector<6x80xf32>
    %19 = tpu.matmul %0, %18, %cst_18 {dimension_numbers = #tpu.dot_dimension_numbers<[1], [0], [0], [1], [0, 0, 1, 1], [], []>} : vector<6x16xf32>, vector<16x80xf32>, vector<6x80xf32> -> vector<6x80xf32>
    %c0_19 = arith.constant 0 : index
    %c2 = arith.constant 2 : index
    %c0_20 = arith.constant 0 : index
    %c0_21 = arith.constant 0 : index
    %20 = vector.load %arg4[%c0_19, %c2, %c0_20, %c0_21] : memref<1x4x16x16xf32, #tpu.memory_space<vmem>>, vector<1x1x16x16xf32>
    %21 = vector.shape_cast %20 : vector<1x1x16x16xf32> to vector<16x16xf32>
    %c0_22 = arith.constant 0 : index
    %c2_23 = arith.constant 2 : index
    %c0_24 = arith.constant 0 : index
    %c0_25 = arith.constant 0 : index
    %22 = vector.load %arg5[%c0_22, %c2_23, %c0_24, %c0_25] : memref<1x4x16x16xf32, #tpu.memory_space<vmem>>, vector<1x1x16x16xf32>
    %23 = vector.shape_cast %22 : vector<1x1x16x16xf32> to vector<16x16xf32>
    %24 = arith.mulf %21, %21 : vector<16x16xf32>
    %25 = arith.mulf %23, %23 : vector<16x16xf32>
    %26 = arith.mulf %21, %23 : vector<16x16xf32>
    %27 = tpu.concatenate %21, %23, %24, %25, %26 in 1 : vector<16x16xf32>, vector<16x16xf32>, vector<16x16xf32>, vector<16x16xf32>, vector<16x16xf32> -> vector<16x80xf32>
    %cst_26 = arith.constant dense<0.000000e+00> : vector<6x80xf32>
    %28 = tpu.matmul %0, %27, %cst_26 {dimension_numbers = #tpu.dot_dimension_numbers<[1], [0], [0], [1], [0, 0, 1, 1], [], []>} : vector<6x16xf32>, vector<16x80xf32>, vector<6x80xf32> -> vector<6x80xf32>
    %c0_27 = arith.constant 0 : index
    %c3 = arith.constant 3 : index
    %c0_28 = arith.constant 0 : index
    %c0_29 = arith.constant 0 : index
    %29 = vector.load %arg4[%c0_27, %c3, %c0_28, %c0_29] : memref<1x4x16x16xf32, #tpu.memory_space<vmem>>, vector<1x1x16x16xf32>
    %30 = vector.shape_cast %29 : vector<1x1x16x16xf32> to vector<16x16xf32>
    %c0_30 = arith.constant 0 : index
    %c3_31 = arith.constant 3 : index
    %c0_32 = arith.constant 0 : index
    %c0_33 = arith.constant 0 : index
    %31 = vector.load %arg5[%c0_30, %c3_31, %c0_32, %c0_33] : memref<1x4x16x16xf32, #tpu.memory_space<vmem>>, vector<1x1x16x16xf32>
    %32 = vector.shape_cast %31 : vector<1x1x16x16xf32> to vector<16x16xf32>
    %33 = arith.mulf %30, %30 : vector<16x16xf32>
    %34 = arith.mulf %32, %32 : vector<16x16xf32>
    %35 = arith.mulf %30, %32 : vector<16x16xf32>
    %36 = tpu.concatenate %30, %32, %33, %34, %35 in 1 : vector<16x16xf32>, vector<16x16xf32>, vector<16x16xf32>, vector<16x16xf32>, vector<16x16xf32> -> vector<16x80xf32>
    %cst_34 = arith.constant dense<0.000000e+00> : vector<6x80xf32>
    %37 = tpu.matmul %0, %36, %cst_34 {dimension_numbers = #tpu.dot_dimension_numbers<[1], [0], [0], [1], [0, 0, 1, 1], [], []>} : vector<6x16xf32>, vector<16x80xf32>, vector<6x80xf32> -> vector<6x80xf32>
    %38 = vector.extract_strided_slice %10 {offsets = [0, 0], sizes = [6, 16], strides = [1, 1]} : vector<6x80xf32> to vector<6x16xf32>
    %cst_35 = arith.constant dense<0.000000e+00> : vector<6x6xf32>
    %39 = tpu.matmul %38, %1, %cst_35 {dimension_numbers = #tpu.dot_dimension_numbers<[1], [0], [0], [1], [0, 0, 1, 1], [], []>} : vector<6x16xf32>, vector<16x6xf32>, vector<6x6xf32> -> vector<6x6xf32>
    %40 = vector.extract_strided_slice %19 {offsets = [0, 0], sizes = [6, 16], strides = [1, 1]} : vector<6x80xf32> to vector<6x16xf32>
    %cst_36 = arith.constant dense<0.000000e+00> : vector<6x6xf32>
    %41 = tpu.matmul %40, %1, %cst_36 {dimension_numbers = #tpu.dot_dimension_numbers<[1], [0], [0], [1], [0, 0, 1, 1], [], []>} : vector<6x16xf32>, vector<16x6xf32>, vector<6x6xf32> -> vector<6x6xf32>
    %42 = vector.extract_strided_slice %28 {offsets = [0, 0], sizes = [6, 16], strides = [1, 1]} : vector<6x80xf32> to vector<6x16xf32>
    %cst_37 = arith.constant dense<0.000000e+00> : vector<6x6xf32>
    %43 = tpu.matmul %42, %1, %cst_37 {dimension_numbers = #tpu.dot_dimension_numbers<[1], [0], [0], [1], [0, 0, 1, 1], [], []>} : vector<6x16xf32>, vector<16x6xf32>, vector<6x6xf32> -> vector<6x6xf32>
    %44 = vector.extract_strided_slice %37 {offsets = [0, 0], sizes = [6, 16], strides = [1, 1]} : vector<6x80xf32> to vector<6x16xf32>
    %cst_38 = arith.constant dense<0.000000e+00> : vector<6x6xf32>
    %45 = tpu.matmul %44, %1, %cst_38 {dimension_numbers = #tpu.dot_dimension_numbers<[1], [0], [0], [1], [0, 0, 1, 1], [], []>} : vector<6x16xf32>, vector<16x6xf32>, vector<6x6xf32> -> vector<6x6xf32>
    %46 = tpu.concatenate %39, %41, %43, %45 in 1 : vector<6x6xf32>, vector<6x6xf32>, vector<6x6xf32>, vector<6x6xf32> -> vector<6x24xf32>
    %47 = vector.extract_strided_slice %10 {offsets = [0, 16], sizes = [6, 16], strides = [1, 1]} : vector<6x80xf32> to vector<6x16xf32>
    %cst_39 = arith.constant dense<0.000000e+00> : vector<6x6xf32>
    %48 = tpu.matmul %47, %1, %cst_39 {dimension_numbers = #tpu.dot_dimension_numbers<[1], [0], [0], [1], [0, 0, 1, 1], [], []>} : vector<6x16xf32>, vector<16x6xf32>, vector<6x6xf32> -> vector<6x6xf32>
    %49 = vector.extract_strided_slice %19 {offsets = [0, 16], sizes = [6, 16], strides = [1, 1]} : vector<6x80xf32> to vector<6x16xf32>
    %cst_40 = arith.constant dense<0.000000e+00> : vector<6x6xf32>
    %50 = tpu.matmul %49, %1, %cst_40 {dimension_numbers = #tpu.dot_dimension_numbers<[1], [0], [0], [1], [0, 0, 1, 1], [], []>} : vector<6x16xf32>, vector<16x6xf32>, vector<6x6xf32> -> vector<6x6xf32>
    %51 = vector.extract_strided_slice %28 {offsets = [0, 16], sizes = [6, 16], strides = [1, 1]} : vector<6x80xf32> to vector<6x16xf32>
    %cst_41 = arith.constant dense<0.000000e+00> : vector<6x6xf32>
    %52 = tpu.matmul %51, %1, %cst_41 {dimension_numbers = #tpu.dot_dimension_numbers<[1], [0], [0], [1], [0, 0, 1, 1], [], []>} : vector<6x16xf32>, vector<16x6xf32>, vector<6x6xf32> -> vector<6x6xf32>
    %53 = vector.extract_strided_slice %37 {offsets = [0, 16], sizes = [6, 16], strides = [1, 1]} : vector<6x80xf32> to vector<6x16xf32>
    %cst_42 = arith.constant dense<0.000000e+00> : vector<6x6xf32>
    %54 = tpu.matmul %53, %1, %cst_42 {dimension_numbers = #tpu.dot_dimension_numbers<[1], [0], [0], [1], [0, 0, 1, 1], [], []>} : vector<6x16xf32>, vector<16x6xf32>, vector<6x6xf32> -> vector<6x6xf32>
    %55 = tpu.concatenate %48, %50, %52, %54 in 1 : vector<6x6xf32>, vector<6x6xf32>, vector<6x6xf32>, vector<6x6xf32> -> vector<6x24xf32>
    %56 = vector.extract_strided_slice %10 {offsets = [0, 32], sizes = [6, 16], strides = [1, 1]} : vector<6x80xf32> to vector<6x16xf32>
    %cst_43 = arith.constant dense<0.000000e+00> : vector<6x6xf32>
    %57 = tpu.matmul %56, %1, %cst_43 {dimension_numbers = #tpu.dot_dimension_numbers<[1], [0], [0], [1], [0, 0, 1, 1], [], []>} : vector<6x16xf32>, vector<16x6xf32>, vector<6x6xf32> -> vector<6x6xf32>
    %58 = vector.extract_strided_slice %19 {offsets = [0, 32], sizes = [6, 16], strides = [1, 1]} : vector<6x80xf32> to vector<6x16xf32>
    %cst_44 = arith.constant dense<0.000000e+00> : vector<6x6xf32>
    %59 = tpu.matmul %58, %1, %cst_44 {dimension_numbers = #tpu.dot_dimension_numbers<[1], [0], [0], [1], [0, 0, 1, 1], [], []>} : vector<6x16xf32>, vector<16x6xf32>, vector<6x6xf32> -> vector<6x6xf32>
    %60 = vector.extract_strided_slice %28 {offsets = [0, 32], sizes = [6, 16], strides = [1, 1]} : vector<6x80xf32> to vector<6x16xf32>
    %cst_45 = arith.constant dense<0.000000e+00> : vector<6x6xf32>
    %61 = tpu.matmul %60, %1, %cst_45 {dimension_numbers = #tpu.dot_dimension_numbers<[1], [0], [0], [1], [0, 0, 1, 1], [], []>} : vector<6x16xf32>, vector<16x6xf32>, vector<6x6xf32> -> vector<6x6xf32>
    %62 = vector.extract_strided_slice %37 {offsets = [0, 32], sizes = [6, 16], strides = [1, 1]} : vector<6x80xf32> to vector<6x16xf32>
    %cst_46 = arith.constant dense<0.000000e+00> : vector<6x6xf32>
    %63 = tpu.matmul %62, %1, %cst_46 {dimension_numbers = #tpu.dot_dimension_numbers<[1], [0], [0], [1], [0, 0, 1, 1], [], []>} : vector<6x16xf32>, vector<16x6xf32>, vector<6x6xf32> -> vector<6x6xf32>
    %64 = tpu.concatenate %57, %59, %61, %63 in 1 : vector<6x6xf32>, vector<6x6xf32>, vector<6x6xf32>, vector<6x6xf32> -> vector<6x24xf32>
    %65 = vector.extract_strided_slice %10 {offsets = [0, 48], sizes = [6, 16], strides = [1, 1]} : vector<6x80xf32> to vector<6x16xf32>
    %cst_47 = arith.constant dense<0.000000e+00> : vector<6x6xf32>
    %66 = tpu.matmul %65, %1, %cst_47 {dimension_numbers = #tpu.dot_dimension_numbers<[1], [0], [0], [1], [0, 0, 1, 1], [], []>} : vector<6x16xf32>, vector<16x6xf32>, vector<6x6xf32> -> vector<6x6xf32>
    %67 = vector.extract_strided_slice %19 {offsets = [0, 48], sizes = [6, 16], strides = [1, 1]} : vector<6x80xf32> to vector<6x16xf32>
    %cst_48 = arith.constant dense<0.000000e+00> : vector<6x6xf32>
    %68 = tpu.matmul %67, %1, %cst_48 {dimension_numbers = #tpu.dot_dimension_numbers<[1], [0], [0], [1], [0, 0, 1, 1], [], []>} : vector<6x16xf32>, vector<16x6xf32>, vector<6x6xf32> -> vector<6x6xf32>
    %69 = vector.extract_strided_slice %28 {offsets = [0, 48], sizes = [6, 16], strides = [1, 1]} : vector<6x80xf32> to vector<6x16xf32>
    %cst_49 = arith.constant dense<0.000000e+00> : vector<6x6xf32>
    %70 = tpu.matmul %69, %1, %cst_49 {dimension_numbers = #tpu.dot_dimension_numbers<[1], [0], [0], [1], [0, 0, 1, 1], [], []>} : vector<6x16xf32>, vector<16x6xf32>, vector<6x6xf32> -> vector<6x6xf32>
    %71 = vector.extract_strided_slice %37 {offsets = [0, 48], sizes = [6, 16], strides = [1, 1]} : vector<6x80xf32> to vector<6x16xf32>
    %cst_50 = arith.constant dense<0.000000e+00> : vector<6x6xf32>
    %72 = tpu.matmul %71, %1, %cst_50 {dimension_numbers = #tpu.dot_dimension_numbers<[1], [0], [0], [1], [0, 0, 1, 1], [], []>} : vector<6x16xf32>, vector<16x6xf32>, vector<6x6xf32> -> vector<6x6xf32>
    %73 = tpu.concatenate %66, %68, %70, %72 in 1 : vector<6x6xf32>, vector<6x6xf32>, vector<6x6xf32>, vector<6x6xf32> -> vector<6x24xf32>
    %74 = vector.extract_strided_slice %10 {offsets = [0, 64], sizes = [6, 16], strides = [1, 1]} : vector<6x80xf32> to vector<6x16xf32>
    %cst_51 = arith.constant dense<0.000000e+00> : vector<6x6xf32>
    %75 = tpu.matmul %74, %1, %cst_51 {dimension_numbers = #tpu.dot_dimension_numbers<[1], [0], [0], [1], [0, 0, 1, 1], [], []>} : vector<6x16xf32>, vector<16x6xf32>, vector<6x6xf32> -> vector<6x6xf32>
    %76 = vector.extract_strided_slice %19 {offsets = [0, 64], sizes = [6, 16], strides = [1, 1]} : vector<6x80xf32> to vector<6x16xf32>
    %cst_52 = arith.constant dense<0.000000e+00> : vector<6x6xf32>
    %77 = tpu.matmul %76, %1, %cst_52 {dimension_numbers = #tpu.dot_dimension_numbers<[1], [0], [0], [1], [0, 0, 1, 1], [], []>} : vector<6x16xf32>, vector<16x6xf32>, vector<6x6xf32> -> vector<6x6xf32>
    %78 = vector.extract_strided_slice %28 {offsets = [0, 64], sizes = [6, 16], strides = [1, 1]} : vector<6x80xf32> to vector<6x16xf32>
    %cst_53 = arith.constant dense<0.000000e+00> : vector<6x6xf32>
    %79 = tpu.matmul %78, %1, %cst_53 {dimension_numbers = #tpu.dot_dimension_numbers<[1], [0], [0], [1], [0, 0, 1, 1], [], []>} : vector<6x16xf32>, vector<16x6xf32>, vector<6x6xf32> -> vector<6x6xf32>
    %80 = vector.extract_strided_slice %37 {offsets = [0, 64], sizes = [6, 16], strides = [1, 1]} : vector<6x80xf32> to vector<6x16xf32>
    %cst_54 = arith.constant dense<0.000000e+00> : vector<6x6xf32>
    %81 = tpu.matmul %80, %1, %cst_54 {dimension_numbers = #tpu.dot_dimension_numbers<[1], [0], [0], [1], [0, 0, 1, 1], [], []>} : vector<6x16xf32>, vector<16x6xf32>, vector<6x6xf32> -> vector<6x6xf32>
    %82 = tpu.concatenate %75, %77, %79, %81 in 1 : vector<6x6xf32>, vector<6x6xf32>, vector<6x6xf32>, vector<6x6xf32> -> vector<6x24xf32>
    %83 = arith.mulf %46, %46 : vector<6x24xf32>
    %84 = arith.mulf %55, %55 : vector<6x24xf32>
    %85 = arith.mulf %46, %55 : vector<6x24xf32>
    %86 = arith.subf %64, %83 : vector<6x24xf32>
    %87 = arith.subf %73, %84 : vector<6x24xf32>
    %88 = arith.subf %82, %85 : vector<6x24xf32>
    %c0_55 = arith.constant 0 : index
    %89 = memref.load %arg1[%c0_55] : memref<2xf32, #tpu.memory_space<smem>>
    %c1_56 = arith.constant 1 : index
    %90 = memref.load %arg1[%c1_56] : memref<2xf32, #tpu.memory_space<smem>>
    %cst_57 = arith.constant 2.000000e+00 : f32
    %91 = vector.broadcast %cst_57 : f32 to vector<6x24xf32>
    %92 = arith.mulf %91, %85 : vector<6x24xf32>
    %93 = vector.broadcast %89 : f32 to vector<6x24xf32>
    %94 = arith.addf %92, %93 : vector<6x24xf32>
    %cst_58 = arith.constant 2.000000e+00 : f32
    %95 = vector.broadcast %cst_58 : f32 to vector<6x24xf32>
    %96 = arith.mulf %95, %88 : vector<6x24xf32>
    %97 = vector.broadcast %90 : f32 to vector<6x24xf32>
    %98 = arith.addf %96, %97 : vector<6x24xf32>
    %99 = arith.mulf %94, %98 : vector<6x24xf32>
    %100 = arith.addf %83, %84 : vector<6x24xf32>
    %101 = vector.broadcast %89 : f32 to vector<6x24xf32>
    %102 = arith.addf %100, %101 : vector<6x24xf32>
    %103 = arith.addf %86, %87 : vector<6x24xf32>
    %104 = vector.broadcast %90 : f32 to vector<6x24xf32>
    %105 = arith.addf %103, %104 : vector<6x24xf32>
    %106 = arith.mulf %102, %105 : vector<6x24xf32>
    %107 = arith.divf %99, %106 : vector<6x24xf32>
    %108 = vector.shape_cast %107 : vector<6x24xf32> to vector<1x6x24xf32>
    %cst_59 = arith.constant dense<0.000000e+00> : vector<1xf32>
    %109 = vector.multi_reduction <add>, %108, %cst_59 [1, 2] : vector<1x6x24xf32> to vector<1xf32>
    %110 = vector.shape_cast %109 : vector<1xf32> to vector<1x1x1xf32>
    %111 = vector.extract %110[0, 0, 0] : f32 from vector<1x1x1xf32>
    %112 = vector.broadcast %111 : f32 to vector<1x8x128xf32>
    %c0_60 = arith.constant 0 : index
    %c0_61 = arith.constant 0 : index
    %c0_62 = arith.constant 0 : index
    %113 = vector.load %arg6[%c0_60, %c0_61, %c0_62] : memref<1x8x128xf32, #tpu.memory_space<vmem>>, vector<1x8x128xf32>
    tpu.vector_store %arg6[%c0_60, %c0_61, %c0_62], %112 {strides = array<i32>} : memref<1x8x128xf32, #tpu.memory_space<vmem>>, vector<1x8x128xf32>,
    return
  }
  func.func @transform_0(%arg0: i32) -> i32 {
    %c0_i32 = arith.constant 0 : i32
    %c0_i32_0 = arith.constant 0 : i32
    return %c0_i32 : i32
  }
  func.func @transform_1(%arg0: i32) -> (i32, i32) {
    %c0_i32 = arith.constant 0 : i32
    %c0_i32_0 = arith.constant 0 : i32
    %c0_i32_1 = arith.constant 0 : i32
    return %c0_i32, %c0_i32_0 : i32, i32
  }
  func.func @transform_2(%arg0: i32) -> (i32, i32) {
    %c0_i32 = arith.constant 0 : i32
    %c0_i32_0 = arith.constant 0 : i32
    %c0_i32_1 = arith.constant 0 : i32
    return %c0_i32, %c0_i32_0 : i32, i32
  }
  func.func @transform_3(%arg0: i32) -> (i32, i32, i32, i32) {
    %c0_i32 = arith.constant 0 : i32
    %c0_i32_0 = arith.constant 0 : i32
    %c0_i32_1 = arith.constant 0 : i32
    %c0_i32_2 = arith.constant 0 : i32
    return %arg0, %c0_i32, %c0_i32_0, %c0_i32_1 : i32, i32, i32, i32
  }
  func.func @transform_4(%arg0: i32) -> (i32, i32, i32, i32) {
    %c0_i32 = arith.constant 0 : i32
    %c0_i32_0 = arith.constant 0 : i32
    %c0_i32_1 = arith.constant 0 : i32
    %c0_i32_2 = arith.constant 0 : i32
    return %arg0, %c0_i32, %c0_i32_0, %c0_i32_1 : i32, i32, i32, i32
  }
  func.func @transform_5(%arg0: i32) -> (i32, i32, i32) {
    %c0_i32 = arith.constant 0 : i32
    %c0_i32_0 = arith.constant 0 : i32
    %c0_i32_1 = arith.constant 0 : i32
    return %arg0, %c0_i32, %c0_i32_0 : i32, i32, i32
  }
}

</mosaic_0001>

<bundles_post_ra>
// kernel: ssim_loss.1
= control target key start
LH: loop header
LB: loop body
LE: loop exit
PB: predicated region body
PF: predicated region fallthrough
CT: control target
= control target key end

     0   :  { %10 = vsyncpa [#allocation4], 0  ;;  %s1927_s0 = inlined_call_operand.vmem [shape: f32[2], index: 0, kind: input, shape index: {}]   ;;  %s1928_s1 = inlined_call_operand.vmem [shape: f32[6,16], index: 1, kind: input, shape index: {}]   ;;  %s1929_s2 = inlined_call_operand.vmem [shape: f32[16,6], index: 2, kind: input, shape index: {}]   ;;  %s1930_s3 = inlined_call_operand.vmem [shape: f32[2,4,16,16], index: 3, kind: input, shape index: {}]   ;;  %s1931_s4 = inlined_call_operand.hbm [shape: f32[2,4,16,16], index: 4, kind: input, shape index: {}]   ;;  %s1932_s5 = inlined_call_operand.vmem [shape: f32[2,8,128], index: 5, kind: output, shape index: {}]  }
   0x1   :  { %11 = vsyncpa [#allocation3], 0 }
   0x2   :  { %13 = vsyncpa [#allocation3 + $0x1], 0  ;;  %s1594_s18 = smov 0   ;;  %s1596_s19 = smov 0  }
   0x3   :  { %s1598_s20 = smov 0   ;;  %s1600_s21 = smov 0  }
   0x4 LB: > { %s1610_s22 = sadd.s32 4294967295, %s1549_s21   ;;  %s1612_s23 = sadd.s32 1, %s1549_s21   ;;  %s1549_s21 = sphi %s1600_s21, %s1939_s21   ;;  %s1545_s20 = sphi %s1598_s20, %s1938_s20   ;;  %s1541_s19 = sphi %s1596_s19, %s1937_s19   ;;  %s1537_s18 = sphi %s1594_s18, %s1936_s18  }
   0x5   : > { %s112_s24 = ssub.s32 %s1549_s21, %s1612_s23  ;;  %s115_s25 = sadd.s32 1, %s1545_s20 }
   0x6   : > { %p113_p0 = scmp.eq.s32.totalorder %s112_s24, 0  ;;  %p122_p1 = scmp.ne.s32.totalorder %s1545_s20, %s1541_s19 }
   0x7   : > { %p123_p2 = scmp.eq.s32.totalorder %s1549_s21, 0  ;;  %p128_p3 = scmp.ne.s32.totalorder %s1541_s19, %s1537_s18 }
   0x8   : > { %s1620_s26 = scalar_select %p113_p0, %s1545_s20, %s115_s25  }
   0x9   : > { %p124_p4 = por %p123_p2, %p122_p1  ;;  %p129_p5 = scmp.eq.s32.totalorder %s1610_s22, 0 }
   0xa   : > { %p1267_p6 = scmp.ge.s32.totalorder %s1549_s21, 1  ;;  %p165_p7 = scmp.lt.s32.totalorder %s1549_s21, 3 }
   0xb   : > { %p1625_p8 = por %p129_p5, %p128_p3  ;;  %s177_s6 = sshll.u32 %s1927_s0, 4  ;;  %s178_s6 = int_to_ptr.vmem [resolvable:$true] %s177_s6 }
   0xc   : > { %p1629_p9 = pnand %p1267_p6, %p165_p7  ;;  %p1337_p11 = scmp.lt.s32.totalorder %s1549_s21, 2 }
   0xd   : > { %s202_s7 = sand.u32 1, %s1545_s20   ;;  %s1551_s10 = smov [#allocation2]  }
   0xe   : > { %p1328_p10 = pneg %p1629_p9  ;;  %p1641_p13 = pnand %p1337_p11, %p124_p4 }
   0xf   : > { %s1270_s9 = sshll.u32 %s202_s7, 6  ;;  %s1318_s11 = sshll.u32 %s1549_s21, 6 }
  0x10   : > { %p1329_p12 = pnand %p1328_p10, %p129_p5  ;;  %s211_s14 = scalar_lea.hbm %s1931_s4, %s1318_s11 }
  0x11   : > { %s206_s15 = scalar_lea.vmem [#allocation5], %s1270_s9  ;;  %s212_s17 = sshll.u32 %s211_s14, 4  ;;  %s213_s17 = int_to_ptr.hbm [resolvable:$true] %s212_s17 }
  0x12   : > { %1331 = dma.vmem_to_smem (!%p1329_p12), %s178_s6, 16, %s1551_s10, [#allocation4]  }
  0x13   : > { %s214_s16 = sshll.u32 %s206_s15, 4  ;;  %s203_s18 = scalar_lea.sflag [#allocation3], %s202_s7  ;;  %s215_s16 = int_to_ptr.vmem [resolvable:$true] %s214_s16 }
  0x14   : > { %s1481_s24 = sshra.s32 %s213_s17, 4  ;;  %p1485_p1 = pneg %p1641_p13  ;;  %s1482_s24 = int_to_ptr.hbm [resolvable:$true] %s1481_s24 }
  0x15   : > { %s1483_s25 = scalar_lea.hbm %s1482_s24, 64  ;;  %s1488_s30 = scalar_lea.hbm %s1931_s4, 128 }
  0x16   : > { %p1484_p0 = scmp.ne.s32.totalorder %s1482_s24, %s1483_s25  ;;  %p1489_p4 = scmp.lt.s32.totalorder %s1482_s24, %s1931_s4 }
  0x17   : > { %p1490_p6 = scmp.lt.s32.totalorder %s1488_s30, %s1483_s25 }
  0x18   : > { %p1486_p2 = pnand %p1485_p1, %p1484_p0 }
  0x19   : > { %p1491_p7 = por %p1490_p6, %p1489_p4 }
  0x1a   : > { %p1487_p3 = pneg %p1486_p2 }
  0x1c   : > { %p1492_p10 = pnand %p1491_p7, %p1487_p3 }
  0x1e   : > { %1495 = shalt.err (!%p1492_p10)
}
  0x1f   : > { %s1552_s7 = smov 128   ;;  %s1553_s9 = smov 8  }
  0x20   : > { %1335 = dma.hbm_to_vmem [thread:$0]  (!%p1641_p13), %s213_s17, 1024, %s215_s16, %s203_s18, %s1552_s7, %s1552_s7, %s1553_s9  }
  0x21   : > { %226 = sbr.rel (%p1629_p9) target bundleno = 910 (0x38e), region = 40 }
  0x26   : > { %1528 = dma.done.wait (%p129_p5), [#allocation4], 16  }
  0x27   : > { %1530 = vsyncadd (%p129_p5), [#allocation4], 4294967280  ;;  %s233_s11 = sand.u32 1, %s1541_s19  }
  0x28   : > { %s1275_s12 = sshll.u32 %s233_s11, 6  ;;  %s234_s13 = scalar_lea.sflag [#allocation3], %s233_s11 }
  0x29   : > { %s1665_s14 = scalar_lea.vmem [#allocation5], %s1275_s12 }
  0x2a   : > { %1532 = dma.done.wait (%p1625_p8), %s234_s13, 1024  }
  0x2b   : > { %1534 = vsyncadd (%p1625_p8), %s234_s13, 4294966272 }
  0x2c   : > { %243 = sfence }
  0x2d   : > { %v1288_v0 = vld [vmem:[%s1665_s14 + $0x28] sm:$0xff]  ;;  %v1293_v1 = vld [vmem:[%s1665_s14 + $0x38] sm:$0xff]  ;;  %v1287_v2 = vld [vmem:[%s1665_s14 + $0x20] sm:$0xff]  ;;  %p270_p5 = scmp.lt.s32.totalorder %s1610_s22, 1  ;;  %s1554_s28 = smov 16   ;;  %vm324_vm0 = vcmask 130048  }
  0x2e   : > { %v1384_v3 = vpack.i.bf16 %v1293_v1, %v1288_v0  ;;  %v1292_v4 = vld [vmem:[%s1665_s14 + $0x30] sm:$0xff]  ;;  %v440_v6 = vmul.f32 %v1288_v0, %v1288_v0  ;;  %v512_v7 = vmul.f32 %v1293_v1, %v1293_v1  ;;  %s1555_s17 = smov 32   ;;  %v439_v19 = vmul.f32 %v1287_v2, %v1287_v2  ;;  %s1556_s18 = smov 48   ;;  %v1283_v31 = vld [vmem:[%s1665_s14 + $0x18] sm:$0xff]  ;;  %v284_v43 = vld [vmem:[%s1665_s14] sm:$0xff] }
  0x2f   : > { %v1389_v5 = vpack.i.bf16 %v1292_v4, %v1287_v2  ;;  %s1941_s22 = smov (!%p270_p5, %s1610_s22), 1  ;;  %v511_v20 = vmul.f32 %v1292_v4, %v1292_v4  ;;  %v1282_v30 = vld [vmem:[%s1665_s14 + $0x10] sm:$0xff]  ;;  %s1557_s24 = smov 64   ;;  %v368_v35 = vmul.f32 %v1283_v31, %v1283_v31  ;;  %v285_v44 = vld [vmem:[%s1665_s14 + $0x8] sm:$0xff]  ;;  %v288_v53 = vmul.f32 %v284_v43, %v284_v43 }
  0x30   : > { %1385 = vrot.lane.b32.xlu0 %v1384_v3, %s1554_s28  ;;  %s1319_s27 = sshll.u32 %s1941_s22, 6  ;;  %v1394_v15 = vpack.i.bf16 %v512_v7, %v440_v6  ;;  %v367_v34 = vmul.f32 %v1282_v30, %v1282_v30  ;;  %v1424_v38 = vpack.i.bf16 %v1282_v30, %v1283_v31  ;;  %v1444_v47 = vpack.i.bf16 %v284_v43, %v285_v44  ;;  %s1558_s7 = smov 112  }
  0x31   : > { %1390 = vrot.lane.b32.xlu1 %v1389_v5, %s1554_s28  ;;  %s1685_s16 = scalar_lea.vmem %s1930_s3, %s1319_s27  ;;  %v1404_v25 = vpack.i.bf16 %v511_v20, %v439_v19  ;;  %v289_v54 = vmul.f32 %v285_v44, %v285_v44  ;;  %vm327_vm1 = vcmask 261120   ;;  %vm330_vm2 = vcmask 392192   ;;  %s1559_s9 = smov 96  }
  0x32   : > { %v1688_v8 = vld [vmem:[%s1685_s16 + $0x28] sm:$0xff]  ;;  %v1691_v9 = vld [vmem:[%s1685_s16 + $0x38] sm:$0xff]  ;;  %v1694_v10 = vld [vmem:[%s1685_s16 + $0x20] sm:$0xff]  ;;  %v1434_v37 = vpack.i.bf16 %v367_v34, %v368_v35  ;;  %vm333_vm3 = vcmask 523264   ;;  %s1560_s11 = smov 80   ;;  %s1561_s12 = smov 6  }
  0x33   : > { %v438_v11 = vmul.f32 %v1688_v8, %v1688_v8  ;;  %v510_v12 = vmul.f32 %v1691_v9, %v1691_v9  ;;  %v1701_v13 = vld [vmem:[%s1685_s16 + $0x30] sm:$0xff]  ;;  %v437_v14 = vmul.f32 %v1694_v10, %v1694_v10  ;;  %v441_v21 = vmul.f32 %v1287_v2, %v1694_v10  ;;  %v1718_v28 = vld [vmem:[%s1685_s16 + $0x18] sm:$0xff]  ;;  %v1730_v39 = vld [vmem:[%s1685_s16] sm:$0xff]  ;;  %s1562_s13 = smov 12   ;;  %s1563_s14 = smov 18  }
  0x34   : > { %v509_v16 = vmul.f32 %v1701_v13, %v1701_v13  ;;  %v513_v22 = vmul.f32 %v1292_v4, %v1701_v13  ;;  %v442_v23 = vmul.f32 %v1288_v0, %v1688_v8  ;;  %v514_v24 = vmul.f32 %v1293_v1, %v1691_v9  ;;  %v1715_v27 = vld [vmem:[%s1685_s16 + $0x10] sm:$0xff]  ;;  %v1733_v40 = vld [vmem:[%s1685_s16 + $0x8] sm:$0xff]  ;;  %s1897_s27 = sld [smem:[#allocation2 + $0x1]]  ;;  %s1278_s8 = sshll.u32 %s1941_s22, 3 }
  0x35   : > { %v1399_v17 = vpack.i.bf16 %v510_v12, %v438_v11  ;;  %v365_v32 = vmul.f32 %v1715_v27, %v1715_v27  ;;  %v366_v33 = vmul.f32 %v1718_v28, %v1718_v28  ;;  %v369_v41 = vmul.f32 %v1282_v30, %v1715_v27 }
  0x36   : > { %v1409_v18 = vpack.i.bf16 %v509_v16, %v437_v14  ;;  %v1419_v26 = vpack.i.bf16 %v513_v22, %v441_v21  ;;  %v1414_v29 = vpack.i.bf16 %v514_v24, %v442_v23  ;;  %v370_v42 = vmul.f32 %v1283_v31, %v1718_v28 }
  0x37   : > { %v1429_v36 = vpack.i.bf16 %v365_v32, %v366_v33  ;;  %v286_v45 = vmul.f32 %v1730_v39, %v1730_v39  ;;  %v287_v46 = vmul.f32 %v1733_v40, %v1733_v40  ;;  %v290_v50 = vmul.f32 %v284_v43, %v1730_v39 }
  0x38   : > { %1400 = vrot.lane.b32.xlu0 %v1399_v17, %s1555_s17  ;;  %1410 = vrot.lane.b32.xlu2 %v1409_v18, %s1555_s17  ;;  %v1439_v48 = vpack.i.bf16 %v369_v41, %v370_v42  ;;  %v291_v51 = vmul.f32 %v285_v44, %v1733_v40  ;;  %v1454_v55 = vpack.i.bf16 %v288_v53, %v289_v54  ;;  %vm679_vm4 = vcmask 48128  }
  0x39   : > { %1395 = vrot.lane.b32.xlu1 %v1394_v15, %s1556_s18  ;;  %v1449_v49 = vpack.i.bf16 %v286_v45, %v287_v46  ;;  %vm681_vm5 = vcmask 97280   ;;  %vm683_vm6 = vcmask 146432   ;;  %vm1164_vm11 = vcmask 193536  }
  0x3a   : > { %v1459_v52 = vpack.i.bf16 %v290_v50, %v291_v51 }
  0x40   : > { %1405 = vrot.lane.b32.xlu0 %v1404_v25, %s1556_s18  ;;  %1415 = vrot.lane.b32.xlu2 %v1414_v29, %s1557_s24 }
  0x41   : > { %1420 = vrot.lane.b32.xlu1 %v1419_v26, %s1557_s24 }
  0x48   : > { %1430 = vrot.lane.b32.xlu0 %v1429_v36, %s1555_s17  ;;  %1425 = vrot.lane.b32.xlu2 %v1424_v38, %s1554_s28 }
  0x49   : > { %1435 = vrot.lane.b32.xlu1 %v1434_v37, %s1556_s18 }
  0x50   : > { %1445 = vrot.lane.b32.xlu0 %v1444_v47, %s1554_s28  ;;  %1440 = vrot.lane.b32.xlu2 %v1439_v48, %s1557_s24  ;;  %s1894_s28 = sld [smem:[#allocation2]] }
  0x51   : > { %1450 = vrot.lane.b32.xlu1 %v1449_v49, %s1555_s17  ;;  %s278_s17 = scalar_lea.vmem %s1932_s5, %s1278_s8 }
  0x58   : > { %1460 = vrot.lane.b32.xlu0 %v1459_v52, %s1557_s24  ;;  %1455 = vrot.lane.b32.xlu2 %v1454_v55, %s1556_s18 }
  0x92   : > { %v1411_v56 = vpop.permute.xlu2 %1410 }
  0x93   : > { %v1413_v20 = vunpack.i.h.bf16 %v1411_v56  ;;  %v1412_v21 = vunpack.i.l.bf16 %v1411_v56 }
  0x9a   : > { %v1416_v59 = vpop.permute.xlu2 %1415 }
  0x9b   : > { %v1418_v2 = vunpack.i.h.bf16 %v1416_v59  ;;  %v1417_v3 = vunpack.i.l.bf16 %v1416_v59 }
  0xa2   : > { %v1386_v57 = vpop.permute.xlu0 %1385  ;;  %v1426_v18 = vpop.permute.xlu2 %1425 }
  0xa3   : > { %v1391_v58 = vpop.permute.xlu1 %1390  ;;  %v1388_v60 = vunpack.i.h.bf16 %v1386_v57  ;;  %v1387_v61 = vunpack.i.l.bf16 %v1386_v57  ;;  %v1428_v36 = vunpack.i.h.bf16 %v1426_v18  ;;  %v1427_v37 = vunpack.i.l.bf16 %v1426_v18 }
  0xa4   : > { %v1393_v11 = vunpack.i.h.bf16 %v1391_v58  ;;  %v1392_v12 = vunpack.i.l.bf16 %v1391_v58 }
  0xa5   : > { %v476_v4 = vsel %vm324_vm0, %v1688_v8, %v1387_v61  ;;  %v548_v5 = vsel %vm324_vm0, %v1691_v9, %v1388_v60  ;;  %v403_v46 = vsel %vm324_vm0, %v1715_v27, %v1428_v36  ;;  %v404_v47 = vsel %vm324_vm0, %v1718_v28, %v1427_v37  ;;  %v1792_v27 = vld [vmem:[%s1929_s2 + $0x8] sm:$0xff] }
  0xa6   : > { %v475_v9 = vsel %vm324_vm0, %v1694_v10, %v1392_v12  ;;  %v547_v22 = vsel %vm324_vm0, %v1701_v13, %v1393_v11  ;;  %v279_v10 = vld [vmem:[%s1928_s1] sm:$0x3f] }
  0xa7   : > { %v477_v31 = vsel %vm327_vm1, %v475_v9, %v1412_v21  ;;  %v549_v32 = vsel %vm327_vm1, %v547_v22, %v1413_v20 }
  0xaa   : > { %v1401_v62 = vpop.permute.xlu0 %1400  ;;  %v1441_v38 = vpop.permute.xlu2 %1440 }
  0xab   : > { %v1403_v63 = vunpack.i.h.bf16 %v1401_v62  ;;  %v1402_v0 = vunpack.i.l.bf16 %v1401_v62  ;;  %v1396_v1 = vpop.permute.xlu1 %1395  ;;  %v1442_v45 = vunpack.i.l.bf16 %v1441_v38  ;;  %v1443_v50 = vunpack.i.h.bf16 %v1441_v38 }
  0xac   : > { %v1398_v6 = vunpack.i.h.bf16 %v1396_v1  ;;  %v1397_v7 = vunpack.i.l.bf16 %v1396_v1 }
  0xad   : > { %v478_v14 = vsel %vm327_vm1, %v476_v4, %v1402_v0  ;;  %v550_v15 = vsel %vm327_vm1, %v548_v5, %v1403_v63 }
  0xae   : > { %v480_v16 = vsel %vm330_vm2, %v478_v14, %v1397_v7  ;;  %v552_v17 = vsel %vm330_vm2, %v550_v15, %v1398_v6 }
  0xaf   : > { %v482_v19 = vsel %vm333_vm3, %v480_v16, %v1417_v3  ;;  %v554_v8 = vsel %vm333_vm3, %v552_v17, %v1418_v2 }
  0xb0   : > { %497 = vmatpush.msra.mxu2 %v482_v19  ;;  %569 = vmatpush.msra.mxu3 %v554_v8 }
  0xb2   : > { %v1406_v23 = vpop.permute.xlu0 %1405  ;;  %v1456_v0 = vpop.permute.xlu2 %1455 }
  0xb3   : > { %v1408_v24 = vunpack.i.h.bf16 %v1406_v23  ;;  %v1407_v25 = vunpack.i.l.bf16 %v1406_v23  ;;  %v1421_v26 = vpop.permute.xlu1 %1420  ;;  %v1458_v3 = vunpack.i.h.bf16 %v1456_v0  ;;  %v1457_v4 = vunpack.i.l.bf16 %v1456_v0 }
  0xb4   : > { %v1423_v29 = vunpack.i.h.bf16 %v1421_v26  ;;  %v1422_v30 = vunpack.i.l.bf16 %v1421_v26 }
  0xb5   : > { %v479_v33 = vsel %vm330_vm2, %v477_v31, %v1407_v25  ;;  %v551_v34 = vsel %vm330_vm2, %v549_v32, %v1408_v24 }
  0xb6   : > { %v481_v13 = vsel %vm333_vm3, %v479_v33, %v1422_v30  ;;  %v553_v35 = vsel %vm333_vm3, %v551_v34, %v1423_v29 }
  0xb7   : > { %498 = vmatpush.msra.mxu2 %v481_v13  ;;  %570 = vmatpush.msra.mxu3 %v553_v35 }
  0xb8   : > { %1289 = vmatmul.msk.f32.vlgmr.msra.gmra.mxu2 %vm324_vm0, %v279_v10  ;;  %1294 = vmatmul.msk.f32.vlgmr.msra.gmra.mxu3 %vm324_vm0, %v279_v10 }
  0xb9   : > { %638 = vmatpush.msrb.mxu2 %v1792_v27  ;;  %661 = vmatpush.msrb.mxu3 %v1792_v27 }
  0xba   : > { %v1431_v41 = vpop.permute.xlu0 %1430 }
  0xbb   : > { %v1433_v42 = vunpack.i.h.bf16 %v1431_v41  ;;  %v1432_v43 = vunpack.i.l.bf16 %v1431_v41  ;;  %v1436_v44 = vpop.permute.xlu1 %1435 }
  0xbc   : > { %v1438_v48 = vunpack.i.h.bf16 %v1436_v44  ;;  %v1437_v49 = vunpack.i.l.bf16 %v1436_v44 }
  0xbd   : > { %v406_v51 = vsel %vm327_vm1, %v404_v47, %v1432_v43  ;;  %v405_v52 = vsel %vm327_vm1, %v403_v46, %v1433_v42 }
  0xbe   : > { %v408_v53 = vsel %vm330_vm2, %v406_v51, %v1437_v49  ;;  %v407_v54 = vsel %vm330_vm2, %v405_v52, %v1438_v48 }
  0xbf   : > { %v410_v55 = vsel %vm333_vm3, %v408_v53, %v1442_v45  ;;  %v409_v56 = vsel %vm333_vm3, %v407_v54, %v1443_v50 }
  0xc0   : > { %425 = vmatpush.msra.mxu1 %v410_v55 }
  0xc2   : > { %426 = vmatpush.msra.mxu1 %v409_v56  ;;  %v1446_v28 = vpop.permute.xlu0 %1445 }
  0xc3   : > { %1284 = vmatmul.msk.f32.vlgmr.msra.gmra.mxu1 %vm324_vm0, %v279_v10  ;;  %v1448_v57 = vunpack.i.h.bf16 %v1446_v28  ;;  %v1447_v58 = vunpack.i.l.bf16 %v1446_v28  ;;  %v1451_v59 = vpop.permute.xlu1 %1450 }
  0xc4   : > { %615 = vmatpush.msrb.mxu1 %v1792_v27  ;;  %v1453_v60 = vunpack.i.h.bf16 %v1451_v59  ;;  %v1452_v61 = vunpack.i.l.bf16 %v1451_v59 }
  0xc5   : > { %v325_v62 = vsel %vm324_vm0, %v1730_v39, %v1448_v57  ;;  %v326_v63 = vsel %vm324_vm0, %v1733_v40, %v1447_v58  ;;  %v1812_v40 = vld [vmem:[%s1929_s2] sm:$0xff] }
  0xc6   : > { %v329_v1 = vsel %vm327_vm1, %v326_v63, %v1452_v61  ;;  %v328_v2 = vsel %vm327_vm1, %v325_v62, %v1453_v60  ;;  %639 = vmatpush.msrb.mxu2 %v1812_v40  ;;  %662 = vmatpush.msrb.mxu3 %v1812_v40 }
  0xc7   : > { %v332_v11 = vsel %vm330_vm2, %v329_v1, %v1457_v4  ;;  %v331_v12 = vsel %vm330_vm2, %v328_v2, %v1458_v3  ;;  %616 = vmatpush.msrb.mxu1 %v1812_v40 }
  0xc8   : > { %775 = vmatpush.msra.mxu3 %v1792_v27  ;;  %751 = vmatpush.msra.mxu2 %v1792_v27 }
  0xc9   : > { %727 = vmatpush.msra.mxu1 %v1792_v27 }
  0xca   : > { %v1461_v5 = vpop.permute.xlu0 %1460  ;;  %776 = vmatpush.msra.mxu3 %v1812_v40  ;;  %752 = vmatpush.msra.mxu2 %v1812_v40 }
  0xcb   : > { %v1463_v6 = vunpack.i.h.bf16 %v1461_v5  ;;  %v1462_v7 = vunpack.i.l.bf16 %v1461_v5  ;;  %728 = vmatpush.msra.mxu1 %v1812_v40 }
  0xcd   : > { %v335_v14 = vsel %vm333_vm3, %v332_v11, %v1462_v7  ;;  %v334_v39 = vsel %vm333_vm3, %v331_v12, %v1463_v6 }
  0xce   : > { %353 = vmatpush.msra.mxu0 %v335_v14 }
  0xd0   : > { %354 = vmatpush.msra.mxu0 %v334_v39 }
  0xd1   : > { %1279 = vmatmul.msk.f32.vlgmr.msra.gmra.mxu0 %vm324_vm0, %v279_v10 }
  0xd2   : > { %592 = vmatpush.msrb.mxu0 %v1792_v27 }
  0xd4   : > { %593 = vmatpush.msrb.mxu0 %v1812_v40 }
  0xd6   : > { %703 = vmatpush.msra.mxu0 %v1792_v27 }
  0xd8   : > { %704 = vmatpush.msra.mxu0 %v1812_v40 }
 0x13b   : > { %v500_v15 = vpop.f32.mrf.mxu2  ;;  %v572_v16 = vpop.f32.mrf.mxu3 }
 0x13c   : > { %1297 = vmatmul.msk.f32.vlgmr.msrb.gmra.mxu2 %vm324_vm0, %v500_v15  ;;  %733 = vrot.lane.b32.xlu1 %v500_v15, %s1558_s7 }
 0x13d   : > { %1298 = vmatmul.msk.f32.vlgmr.msrb.gmra.mxu3 %vm324_vm0, %v572_v16  ;;  %757 = vrot.lane.b32.xlu2 %v572_v16, %s1558_s7 }
 0x13e   : > { %886 = vmatpush.msrb.mxu3 %v1792_v27  ;;  %862 = vmatpush.msrb.mxu2 %v1792_v27 }
 0x140   : > { %v428_v17 = vpop.f32.mrf.mxu1  ;;  %887 = vmatpush.msrb.mxu3 %v1812_v40  ;;  %863 = vmatpush.msrb.mxu2 %v1812_v40 }
 0x141   : > { %1296 = vmatmul.msk.f32.vlgmr.msrb.gmra.mxu1 %vm324_vm0, %v428_v17  ;;  %709 = vrot.lane.b32.xlu0 %v428_v17, %s1558_s7 }
 0x142   : > { %838 = vmatpush.msrb.mxu1 %v1792_v27 }
 0x144   : > { %844 = vrot.lane.b32.xlu1 %v500_v15, %s1559_s9  ;;  %839 = vmatpush.msrb.mxu1 %v1812_v40 }
 0x145   : > { %868 = vrot.lane.b32.xlu2 %v572_v16, %s1559_s9 }
 0x149   : > { %820 = vrot.lane.b32.xlu0 %v428_v17, %s1559_s9 }
 0x14c   : > { %955 = vrot.lane.b32.xlu1 %v500_v15, %s1560_s11 }
 0x14d   : > { %979 = vrot.lane.b32.xlu2 %v572_v16, %s1560_s11 }
 0x14e   : > { %v356_v18 = vpop.f32.mrf.mxu0 }
 0x14f   : > { %1295 = vmatmul.msk.f32.vlgmr.msrb.gmra.mxu0 %vm324_vm0, %v356_v18 }
 0x150   : > { %814 = vmatpush.msrb.mxu0 %v1792_v27 }
 0x151   : > { %931 = vrot.lane.b32.xlu0 %v428_v17, %s1560_s11 }
 0x152   : > { %815 = vmatpush.msrb.mxu0 %v1812_v40 }
 0x154   : > { %1066 = vrot.lane.b32.xlu1 %v500_v15, %s1557_s24 }
 0x155   : > { %1090 = vrot.lane.b32.xlu2 %v572_v16, %s1557_s24 }
 0x159   : > { %1042 = vrot.lane.b32.xlu0 %v428_v17, %s1557_s24 }
 0x15c   : > { %685 = vrot.lane.b32.xlu1 %v356_v18, %s1558_s7 }
 0x15d   : > { %796 = vrot.lane.b32.xlu2 %v356_v18, %s1559_s9 }
 0x161   : > { %907 = vrot.lane.b32.xlu0 %v356_v18, %s1560_s11 }
 0x164   : > { %1018 = vrot.lane.b32.xlu1 %v356_v18, %s1557_s24 }
 0x197   : > { %v758_v19 = vpop.permute.xlu2 %757 }
 0x198   : > { %1302 = vmatmul.msk.f32.vlgmr.msra.gmra.mxu3 %vm324_vm0, %v758_v19  ;;  %v1138_v19 = vstv %s1894_s28 }
 0x199   : > { %997 = vmatpush.msra.mxu3 %v1792_v27 }
 0x19b   : > { %998 = vmatpush.msra.mxu3 %v1812_v40 }
 0x19f   : > { %v869_v8 = vpop.permute.xlu2 %868 }
 0x1a0   : > { %1306 = vmatmul.msk.f32.vlgmr.msrb.gmra.mxu3 %vm324_vm0, %v869_v8  ;;  %v1141_v8 = vstv %s1897_s27 }
 0x1a1   : > { %1108 = vmatpush.msrb.mxu3 %v1792_v27 }
 0x1a3   : > { %1109 = vmatpush.msrb.mxu3 %v1812_v40 }
 0x1a7   : > { %v980_v20 = vpop.permute.xlu2 %979 }
 0x1a8   : > { %1310 = vmatmul.msk.f32.vlgmr.msra.gmra.mxu3 %vm324_vm0, %v980_v20 }
 0x1ae   : > { %v734_v21 = vpop.permute.xlu1 %733 }
 0x1af   : > { %1301 = vmatmul.msk.f32.vlgmr.msra.gmra.mxu2 %vm324_vm0, %v734_v21  ;;  %v1091_v9 = vpop.permute.xlu2 %1090 }
 0x1b0   : > { %1314 = vmatmul.msk.f32.vlgmr.msrb.gmra.mxu3 %vm324_vm0, %v1091_v9  ;;  %973 = vmatpush.msra.mxu2 %v1792_v27 }
 0x1b2   : > { %974 = vmatpush.msra.mxu2 %v1812_v40 }
 0x1b3   : > { %v710_v22 = vpop.permute.xlu0 %709 }
 0x1b4   : > { %1300 = vmatmul.msk.f32.vlgmr.msra.gmra.mxu1 %vm324_vm0, %v710_v22 }
 0x1b5   : > { %949 = vmatpush.msra.mxu1 %v1792_v27 }
 0x1b6   : > { %v845_v23 = vpop.permute.xlu1 %844 }
 0x1b7   : > { %1305 = vmatmul.msk.f32.vlgmr.msrb.gmra.mxu2 %vm324_vm0, %v845_v23  ;;  %950 = vmatpush.msra.mxu1 %v1812_v40  ;;  %v797_v10 = vpop.permute.xlu2 %796 }
 0x1b8   : > { %1084 = vmatpush.msrb.mxu2 %v1792_v27 }
 0x1ba   : > { %1085 = vmatpush.msrb.mxu2 %v1812_v40 }
 0x1bb   : > { %v821_v24 = vpop.permute.xlu0 %820 }
 0x1bc   : > { %1304 = vmatmul.msk.f32.vlgmr.msrb.gmra.mxu1 %vm324_vm0, %v821_v24 }
 0x1bd   : > { %1060 = vmatpush.msrb.mxu1 %v1792_v27 }
 0x1be   : > { %v618_v25 = vpop.f32.mrf.mxu1  ;;  %v956_v26 = vpop.permute.xlu1 %955 }
 0x1bf   : > { %v641_v29 = vpop.f32.mrf.mxu2  ;;  %1309 = vmatmul.msk.f32.vlgmr.msra.gmra.mxu2 %vm324_vm0, %v956_v26  ;;  %668 = vrot.lane.b32.xlu2 %v618_v25, %s1561_s12 }
 0x1c0   : > { %v664_v30 = vpop.f32.mrf.mxu3  ;;  %672 = vrot.lane.b32.xlu1 %v641_v29, %s1562_s13  ;;  %1061 = vmatpush.msrb.mxu1 %v1812_v40 }
 0x1c1   : > { %676 = vrot.lane.b32.xlu0 %v664_v30, %s1563_s14 }
 0x1c3   : > { %v932_v31 = vpop.permute.xlu0 %931 }
 0x1c4   : > { %1308 = vmatmul.msk.f32.vlgmr.msra.gmra.mxu1 %vm324_vm0, %v932_v31 }
 0x1c6   : > { %v1067_v32 = vpop.permute.xlu1 %1066 }
 0x1c7   : > { %1313 = vmatmul.msk.f32.vlgmr.msrb.gmra.mxu2 %vm324_vm0, %v1067_v32 }
 0x1cb   : > { %v1043_v33 = vpop.permute.xlu0 %1042 }
 0x1cc   : > { %1312 = vmatmul.msk.f32.vlgmr.msrb.gmra.mxu1 %vm324_vm0, %v1043_v33  ;;  %v595_v50 = vpop.f32.mrf.mxu0 }
 0x1ce   : > { %v686_v34 = vpop.permute.xlu1 %685 }
 0x1cf   : > { %1299 = vmatmul.msk.f32.vlgmr.msra.gmra.mxu0 %vm324_vm0, %v686_v34 }
 0x1d0   : > { %925 = vmatpush.msra.mxu0 %v1792_v27 }
 0x1d2   : > { %926 = vmatpush.msra.mxu0 %v1812_v40 }
 0x1d3   : > { %v908_v13 = vpop.permute.xlu0 %907 }
 0x1d6   : > { %v1019_v35 = vpop.permute.xlu1 %1018 }
 0x1d7   : > { %1303 = vmatmul.msk.f32.vlgmr.msrb.gmra.mxu0 %vm324_vm0, %v797_v10 }
 0x1d8   : > { %1036 = vmatpush.msrb.mxu0 %v1792_v27 }
 0x1da   : > { %1037 = vmatpush.msrb.mxu0 %v1812_v40 }
 0x1df   : > { %1307 = vmatmul.msk.f32.vlgmr.msra.gmra.mxu0 %vm324_vm0, %v908_v13 }
 0x1e7   : > { %1311 = vmatmul.msk.f32.vlgmr.msrb.gmra.mxu0 %vm324_vm0, %v1019_v35 }
 0x219   : > { %v669_v51 = vpop.permute.xlu2 %668 }
 0x21a   : > { %v680_v63 = vsel %vm679_vm4, %v595_v50, %v669_v51 }
 0x21b   : > { %v778_v36 = vpop.f32.mrf.mxu3 }
 0x21c   : > { %790 = vrot.lane.b32.xlu1 %v778_v36, %s1563_s14 }
 0x223   : > { %v889_v41 = vpop.f32.mrf.mxu3 }
 0x22b   : > { %v1000_v44 = vpop.f32.mrf.mxu3 }
 0x231   : > { %v730_v37 = vpop.f32.mrf.mxu1 }
 0x232   : > { %v754_v38 = vpop.f32.mrf.mxu2  ;;  %782 = vrot.lane.b32.xlu0 %v730_v37, %s1561_s12  ;;  %v673_v52 = vpop.permute.xlu1 %672 }
 0x233   : > { %v1111_v47 = vpop.f32.mrf.mxu3  ;;  %v677_v55 = vpop.permute.xlu0 %676  ;;  %v682_v1 = vsel %vm681_vm5, %v680_v63, %v673_v52 }
 0x234   : > { %v684_v6 = vsel %vm683_vm6, %v682_v1, %v677_v55 }
 0x235   : > { %v1129_v14 = vmul.f32 %v684_v6, %v684_v6 }
 0x239   : > { %v841_v42 = vpop.f32.mrf.mxu1 }
 0x23a   : > { %v865_v43 = vpop.f32.mrf.mxu2  ;;  %893 = vrot.lane.b32.xlu2 %v841_v42, %s1561_s12 }
 0x23b   : > { %897 = vrot.lane.b32.xlu1 %v865_v43, %s1562_s13 }
 0x241   : > { %v952_v45 = vpop.f32.mrf.mxu1 }
 0x242   : > { %1004 = vrot.lane.b32.xlu0 %v952_v45, %s1561_s12  ;;  %786 = vrot.lane.b32.xlu2 %v754_v38, %s1562_s13  ;;  %v976_v46 = vpop.f32.mrf.mxu2 }
 0x243   : > { %1012 = vrot.lane.b32.xlu1 %v1000_v44, %s1563_s14 }
 0x249   : > { %v1063_v48 = vpop.f32.mrf.mxu1 }
 0x24a   : > { %901 = vrot.lane.b32.xlu0 %v889_v41, %s1563_s14  ;;  %1008 = vrot.lane.b32.xlu2 %v976_v46, %s1562_s13  ;;  %v1087_v49 = vpop.f32.mrf.mxu2 }
 0x24b   : > { %1123 = vrot.lane.b32.xlu1 %v1111_v47, %s1563_s14 }
 0x24c   : > { %v706_v53 = vpop.f32.mrf.mxu0 }
 0x252   : > { %1119 = vrot.lane.b32.xlu0 %v1087_v49, %s1562_s13  ;;  %1115 = vrot.lane.b32.xlu2 %v1063_v48, %s1561_s12 }
 0x254   : > { %v817_v27 = vpop.f32.mrf.mxu0 }
 0x25c   : > { %v928_v60 = vpop.f32.mrf.mxu0 }
 0x264   : > { %v1039_v23 = vpop.f32.mrf.mxu0 }
 0x28e   : > { %v791_v56 = vpop.permute.xlu1 %790 }
 0x294   : > { %v894_v54 = vpop.permute.xlu2 %893 }
 0x295   : > { %v904_v11 = vsel %vm679_vm4, %v817_v27, %v894_v54 }
 0x29c   : > { %v787_v57 = vpop.permute.xlu2 %786 }
 0x2a4   : > { %v783_v28 = vpop.permute.xlu0 %782  ;;  %v1009_v2 = vpop.permute.xlu2 %1008 }
 0x2a5   : > { %v793_v59 = vsel %vm679_vm4, %v706_v53, %v783_v28 }
 0x2a6   : > { %v794_v61 = vsel %vm681_vm5, %v793_v59, %v787_v57 }
 0x2a7   : > { %v795_v3 = vsel %vm683_vm6, %v794_v61, %v791_v56 }
 0x2a8   : > { %v1130_v7 = vmul.f32 %v795_v3, %v795_v3  ;;  %v1131_v32 = vmul.f32 %v795_v3, %v684_v6 }
 0x2aa   : > { %v1144_v16 = vadd.f32 %v1130_v7, %v1129_v14  ;;  %v1137_v35 = vmul.f32 2.0, %v1131_v32 }
 0x2ac   : > { %v1116_v21 = vpop.permute.xlu2 %1115  ;;  %v1145_v9 = vadd.f32 %v1144_v16, %v1138_v19  ;;  %v1139_v43 = vadd.f32 %v1138_v19, %v1137_v35 }
 0x2ad   : > { %v898_v58 = vpop.permute.xlu1 %897  ;;  %v1126_v24 = vsel %vm679_vm4, %v1039_v23, %v1116_v21 }
 0x2ae   : > { %v905_v39 = vsel %vm681_vm5, %v904_v11, %v898_v58 }
 0x2b4   : > { %v1005_v62 = vpop.permute.xlu0 %1004 }
 0x2b5   : > { %v1015_v0 = vsel %vm679_vm4, %v928_v60, %v1005_v62  ;;  %v1013_v4 = vpop.permute.xlu1 %1012 }
 0x2b6   : > { %v1016_v5 = vsel %vm681_vm5, %v1015_v0, %v1009_v2 }
 0x2b7   : > { %v1017_v12 = vsel %vm683_vm6, %v1016_v5, %v1013_v4 }
 0x2b8   : > { %v1133_v17 = vsub.f32 %v1017_v12, %v1130_v7 }
 0x2bc   : > { %v902_v40 = vpop.permute.xlu0 %901 }
 0x2bd   : > { %v906_v15 = vsel %vm683_vm6, %v905_v39, %v902_v40  ;;  %v1124_v29 = vpop.permute.xlu1 %1123 }
 0x2be   : > { %v1132_v18 = vsub.f32 %v906_v15, %v1129_v14 }
 0x2c0   : > { %v1146_v20 = vadd.f32 %v1133_v17, %v1132_v18 }
 0x2c2   : > { %v1147_v22 = vadd.f32 %v1146_v20, %v1141_v8 }
 0x2c4   : > { %v1148_v25 = vmul.f32 %v1147_v22, %v1145_v9  ;;  %v1120_v26 = vpop.permute.xlu0 %1119 }
 0x2c5   : > { %v1127_v30 = vsel %vm681_vm5, %v1126_v24, %v1120_v26 }
 0x2c6   : > { %1464 = vrcp.f32 %v1148_v25  ;;  %v1128_v31 = vsel %vm683_vm6, %v1127_v30, %v1124_v29  ;;  %v1160_v37 = vand.u32 2147483648, %v1148_v25  ;;  %v1158_v42 = vand.u32 2147483647, %v1148_v25 }
 0x2c7   : > { %v1134_v33 = vsub.f32 %v1128_v31, %v1131_v32  ;;  %vm1154_vm8 = vweird.f32 %v1148_v25 }
 0x2c8   : > { %v1161_v45 = vor.u32 1.1754944e-38, %v1160_v37  ;;  %vm1159_vm10 = vcmp.eq.f32.partialorder %v1158_v42, 8.507059e+37 }
 0x2c9   : > { %v1140_v10 = vmul.f32 2.0, %v1134_v33 }
 0x2cb   : > { %v1142_v38 = vadd.f32 %v1141_v8, %v1140_v10 }
 0x2cc   : > { %v1465_v34 = vpop.eup %1464 }
 0x2cd   : > { %v1150_v13 = vmul.f32 %v1465_v34, %v1148_v25  ;;  %vm1155_vm7 = vweird.f32 %v1465_v34  ;;  %v1143_v46 = vmul.f32 %v1142_v38, %v1139_v43 }
 0x2ce   : > { %vm1156_vm9 = vmor %vm1154_vm8, %vm1155_vm7 }
 0x2cf   : > { %v1151_v36 = vsub.f32 1.0, %v1150_v13 }
 0x2d1   : > { %v1152_v41 = vmul.f32 %v1465_v34, %v1151_v36 }
 0x2d3   : > { %v1153_v44 = vadd.f32 %v1465_v34, %v1152_v41 }
 0x2d5   : > { %v1157_v47 = vsel %vm1156_vm9, %v1465_v34, %v1153_v44 }
 0x2d6   : > { %v1162_v48 = vsel %vm1159_vm10, %v1161_v45, %v1157_v47 }
 0x2d7   : > { %v1163_v49 = vmul.f32 %v1162_v48, %v1143_v46 }
 0x2d9   : > { %v1165_v50 = vsel %vm1164_vm11, %v1163_v49, 0.0 }
 0x2da   : > { %1166 = vadd.xlane.f32.xlu2 %v1165_v50 }
 0x34d   : > { %v1167_v51 = vpop.xlane.xlu2 %1166 }
 0x34e   : > { %v1168_v52 = vrot.slane %v1167_v51, 4 }
 0x350   : > { %v1169_v53 = vadd.f32 %v1168_v52, %v1167_v51 }
 0x352   : > { %v1170_v54 = vrot.slane %v1169_v53, 2 }
 0x354   : > { %v1171_v55 = vadd.f32 %v1170_v54, %v1169_v53 }
 0x356   : > { %v1172_v56 = vrot.slane %v1171_v55, 1 }
 0x358   : > { %v1173_v27 = vadd.f32 %v1172_v56, %v1171_v55 }
 0x35a   : > { %1320 = vpush %v1173_v27 }
 0x38b   : > { %s1321_s18 = spop %1320 }
 0x38c   : > { %v1175_v28 = vstv %s1321_s18 }
 0x38d   : > { %1176 = vst [vmem:[%s278_s17] sm:$0xff] %v1175_v28 }
 0x38e PF: > { %p16_p8 = scmp.ge.s32.totalorder %s1612_s23, 4   ;;  %s1936_s18 = smov %s1541_s19 }
 0x38f   : > { %s1937_s19 = smov %s1545_s20  ;;  %s1938_s20 = smov %s1620_s26 }
 0x390   : > { %s1939_s21 = smov %s1612_s23  ;;  %18 = sbr.rel (!%p16_p8) target bundleno = 4 (0x4), region = 94 }
 0x395   :  { %1196 = vsyncpa [#allocation3], 1 }
 0x396   :  { %1198 = vsyncpa [#allocation3 + $0x1], 1 }
 0x397   :  { %1199 = vsyncpa [#allocation4], 1 }
 0x398   :  { %1201 = vsyncpa [#allocation4 + $0x1], 1 }

</bundles_post_ra>
